<compile_context>
chip_gen: v7x
topology: tpu7x:2x2x1
jax: 0.10.0
libtpu: 0.0.40
codegen_flags: <defaults>
</compile_context>

<pallas_src>
import functools

import jax
import jax.numpy as jnp
from jax import lax
from jax.experimental import pallas as pl
from jax.experimental.pallas import tpu as pltpu

_LANE = 128
_SUBLANE = 8


def _round_up(x: int, m: int) -> int:
    return ((x + m - 1) // m) * m


def _pad_axis(x, axis: int, target: int):
    pad = target - x.shape[axis]
    if pad == 0:
        return x
    cfg = [(0, 0)] * x.ndim
    cfg[axis] = (0, pad)
    return jnp.pad(x, cfg)


def _pick_b_tile(batch: int) -> int:
    """Batch tile: multiple of 8, at most 128, with limited padding waste."""
    if batch <= 128:
        return _round_up(batch, _SUBLANE)
    for cand in (128, 64, 32, 16, 8):
        pad = _round_up(batch, cand)
        if (pad - batch) * 8 <= pad:        # <= 12.5% padded rows
            return cand
    return _SUBLANE


def _vmem_estimate(t_blk: int, b_tile: int, in_f: int, units: int,
                   cd_bytes: int) -> int:
    """Rough VMEM footprint (internal lane/sublane padding included)."""
    in_f_l = _round_up(in_f, _LANE)
    units_l = _round_up(units, _LANE)
    in_f_s = _round_up(in_f, 2 * _SUBLANE)
    units_s = _round_up(units, 2 * _SUBLANE)
    return (2 * t_blk * b_tile * in_f_l * cd_bytes        # u double buffer
            + 2 * t_blk * b_tile * units_l * 4            # xp double buffer
            + 2 * b_tile * units_l * 4                    # x0 double buffer
            + b_tile * units_l * 4                        # state-carry scratch
            + 2 * (in_f_s * units_l + units_s * units_l) * cd_bytes  # weights
            + 2 * _SUBLANE * units_l * 4)                 # bias


def _pick_t_blk(T: int, b_tile: int, in_f: int, units: int, cd_bytes: int,
                budget_bytes: int = 20 << 20) -> int:
    """Largest power-of-two time block (<=64) whose VMEM estimate fits."""
    cap = 1
    while cap < min(max(T, 1), 64):
        cap *= 2
    t_blk = cap
    while t_blk > 1 and _vmem_estimate(t_blk, b_tile, in_f, units,
                                       cd_bytes) > budget_bytes:
        t_blk //= 2
    return t_blk


def _rnn_kernel(u_ref, x0_ref, wt_ref, ut_ref, b_ref, out_ref, x_ref, *,
                compute_dtype, unroll):
    """One (batch block, time block) grid step: T_BLK fused recurrence steps.

    u_ref  : (T_BLK, b_tile, in_features)  streamed input, compute_dtype
    x0_ref : (b_tile, units)               initial state, f32
    wt_ref : (in_features, units)          W.T, VMEM-resident, compute_dtype
    ut_ref : (units, units)                U.T, VMEM-resident, compute_dtype
    b_ref  : (1, units)                    bias, f32
    out_ref: (T_BLK, b_tile, units)        xp output, f32
    x_ref  : (b_tile, units) f32 VMEM scratch — state carry across grid steps.
    """
    tb = pl.program_id(1)

    @pl.when(tb == 0)
    def _():
        # New batch block: (re)load the initial state into the carry.
        x_ref[...] = x0_ref[...]

    t_blk = u_ref.shape[0]

    def step(i, carry):
        # Input projection: independent of the carry — the scheduler can run
        # it ahead of / under the serial recurrent matmul.
        p = jnp.dot(u_ref[i], wt_ref[...], preferred_element_type=jnp.float32)
        # Recurrent term: serial dependency through the f32 state carry.
        acc = jnp.dot(x_ref[...].astype(compute_dtype), ut_ref[...],
                      preferred_element_type=jnp.float32)
        xp = jnp.tanh(p + acc + b_ref[...])        # f32 bias + tanh
        out_ref[i] = xp.astype(out_ref.dtype)
        x_ref[...] = xp                            # carry x(t+1), f32
        return carry

    lax.fori_loop(0, t_blk, step, 0, unroll=unroll)


def state_space_vanilla_rnn_sequence(u_seq, xk0, W, U, b, *, io_delay=True,
                                     compute_dtype=jnp.bfloat16,
                                     t_blk=None, b_tile=None):
    """Fused multi-step forward.

    u_seq : (T, batch, in_features)   xk0 : (batch, units)
    W : (units, in_features)  U : (units, units)  b : (units,)
    Returns (y_seq, xp_seq), each (T, batch, units):
      xp_seq[t] = x(t+1);  y_seq[t] = x(t) if io_delay else x(t+1).

    compute_dtype: MXU-input dtype (default bf16; accumulation, bias, tanh
    and the state carry are always f32).  Use jnp.float32 for exact numerics.
    """
    T, batch, in_features = u_seq.shape
    units = U.shape[0]
    assert W.shape == (units, in_features) and b.shape == (units,)

    if b_tile is None:
        b_tile = _pick_b_tile(batch)
    batch_pad = _round_up(batch, b_tile)

    cd_bytes = jnp.dtype(compute_dtype).itemsize
    if t_blk is None:
        t_blk = _pick_t_blk(T, b_tile, in_features, units, cd_bytes)
    t_pad = _round_up(T, t_blk)

    # Weights pre-transposed + cast once (constant-fold under jit).
    wt = W.T.astype(compute_dtype)                   # (in_features, units)
    ut = U.T.astype(compute_dtype)                   # (units, units)
    b_row = b.reshape(1, units).astype(jnp.float32)

    # Stream u in the MXU-input dtype; pad only batch (to b_tile) and T
    # (to t_blk) — no lane padding of the feature dim.
    u_p = _pad_axis(_pad_axis(u_seq.astype(compute_dtype), 0, t_pad), 1, batch_pad)
    x0_p = _pad_axis(xk0.astype(jnp.float32), 0, batch_pad)

    est = _vmem_estimate(t_blk, b_tile, in_features, units, cd_bytes)
    vmem_limit = int(min(max(32 << 20, est + (4 << 20)), 64 << 20))

    grid = (batch_pad // b_tile, t_pad // t_blk)
    kernel = functools.partial(_rnn_kernel, compute_dtype=compute_dtype,
                               unroll=max(1, min(t_blk, 8)))

    xp_pad = pl.pallas_call(
        kernel,
        out_shape=jax.ShapeDtypeStruct((t_pad, batch_pad, units), jnp.float32),
        grid_spec=pltpu.PrefetchScalarGridSpec(
            num_scalar_prefetch=0,
            grid=grid,
            in_specs=[
                # u: streamed per (batch block, time block)
                pl.BlockSpec((t_blk, b_tile, in_features),
                             lambda bb, tb: (tb, bb, 0)),
                # x0: fetched once per batch block
                pl.BlockSpec((b_tile, units), lambda bb, tb: (bb, 0)),
                # W.T / U.T / bias: VMEM-resident across all grid steps
                pl.BlockSpec((in_features, units), lambda bb, tb: (0, 0)),
                pl.BlockSpec((units, units), lambda bb, tb: (0, 0)),
                pl.BlockSpec((1, units), lambda bb, tb: (0, 0)),
            ],
            out_specs=pl.BlockSpec((t_blk, b_tile, units),
                                   lambda bb, tb: (tb, bb, 0)),
            scratch_shapes=[pltpu.VMEM((b_tile, units), jnp.float32)],
        ),
        compiler_params=pltpu.CompilerParams(
            dimension_semantics=("parallel", "arbitrary"),
            vmem_limit_bytes=vmem_limit),
    )(u_p, x0_p, wt, ut, b_row)

    xp_seq = xp_pad[:T, :batch, :]
    if io_delay:
        y_seq = jnp.concatenate([xk0[None].astype(xp_seq.dtype), xp_seq[:-1]],
                                axis=0)
    else:
        y_seq = xp_seq
    return y_seq, xp_seq


def state_space_vanilla_rnn_forward(u, xk, W, U, b, io_delay=True,
                                    compute_dtype=jnp.bfloat16):
    """Single-step forward matching the PyTorch module: returns (y, xp)."""
    _, xp_seq = state_space_vanilla_rnn_sequence(
        u[None], xk, W, U, b, io_delay=io_delay, compute_dtype=compute_dtype)
    xp = xp_seq[0]
    y = xk if io_delay else xp
    return y, xp


def init_params(key, units, in_features, origin_equilibrium=False):
    """Mirror reset_parameters(): W, U ~ U(-1/units, 1/units); b = zeros."""
    kw, ku = jax.random.split(key)
    bound = 1.0 / units
    W = jax.random.uniform(kw, (units, in_features), jnp.float32, -bound, bound)
    U = jax.random.uniform(ku, (units, units), jnp.float32, -bound, bound)
    b = jnp.zeros((units,), jnp.float32)   # origin_equilibrium: b already zero
    return W, U, b


if __name__ == "__main__":
    key = jax.random.PRNGKey(0)
    k_params, k_u, k_x0, k_u2, k_x02 = jax.random.split(key, 5)

    units, in_features, batch, seq_len = 32, 16, 8, 8
    W, U, b = init_params(k_params, units, in_features)
    u_seq = jax.random.normal(k_u, (seq_len, batch, in_features), jnp.float32)
    # initial_states(n_batches, stdv=0.5): 0.5 * randn(batch, units)
    xk0 = 0.5 * jax.random.normal(k_x0, (batch, units), jnp.float32)

    def ref_scan(u_s, x0):
        def step(x, u):
            xp = jnp.tanh(u @ W.T + x @ U.T + b)
            return xp, xp
        _, xp = jax.lax.scan(step, x0, u_s)
        return xp

    xp_ref = ref_scan(u_seq, xk0)
    y_ref = jnp.concatenate([xk0[None], xp_ref[:-1]], axis=0)

    # f32 MXU-input path: tight check against the pure-JAX recurrence.
    y_f32, xp_f32 = state_space_vanilla_rnn_sequence(
        u_seq, xk0, W, U, b, io_delay=True, compute_dtype=jnp.float32)
    jax.block_until_ready((y_f32, xp_f32))
    assert jnp.allclose(xp_f32, xp_ref, atol=1e-3, rtol=1e-3)
    assert jnp.allclose(y_f32, y_ref, atol=1e-3, rtol=1e-3)

    # Default bf16 MXU-input fast path (f32 accumulation / bias / tanh / carry).
    y_bf, xp_bf = state_space_vanilla_rnn_sequence(u_seq, xk0, W, U, b,
                                                   io_delay=True)
    jax.block_until_ready((y_bf, xp_bf))
    assert jnp.allclose(xp_bf, xp_ref, atol=0.1, rtol=0.1)

    # Ragged shapes: T not a multiple of T_BLK, batch not a multiple of 8.
    T2, batch2 = 5, 6
    u2 = jax.random.normal(k_u2, (T2, batch2, in_features), jnp.float32)
    x02 = 0.5 * jax.random.normal(k_x02, (batch2, units), jnp.float32)
    _, xp2 = state_space_vanilla_rnn_sequence(u2, x02, W, U, b,
                                              compute_dtype=jnp.float32)
    jax.block_until_ready(xp2)
    assert jnp.allclose(xp2, ref_scan(u2, x02), atol=1e-3, rtol=1e-3)

    # Single-step API matching the PyTorch module's forward exactly.
    y1, xp1 = state_space_vanilla_rnn_forward(u_seq[0], xk0, W, U, b,
                                              io_delay=True,
                                              compute_dtype=jnp.float32)
    jax.block_until_ready((y1, xp1))
    assert jnp.array_equal(y1, xk0)   # io_delay=True returns x(k) unchanged
    assert jnp.allclose(xp1, jnp.tanh(u_seq[0] @ W.T + xk0 @ U.T + b),
                        atol=1e-3, rtol=1e-3)

    print("KERNEL_OK")
</pallas_src>

<mosaic_0001>
module attributes {stable_mosaic.version = 11 : i64} {
  func.func @_rnn_kernel(%arg0: i32, %arg1: i32, %arg2: memref<8x8x16xf32, #tpu.memory_space<vmem>>, %arg3: memref<8x32xf32, #tpu.memory_space<vmem>>, %arg4: memref<16x32xf32, #tpu.memory_space<vmem>>, %arg5: memref<32x32xf32, #tpu.memory_space<vmem>>, %arg6: memref<1x32xf32, #tpu.memory_space<vmem>>, %arg7: memref<8x8x32xf32, #tpu.memory_space<vmem>>, %arg8: memref<8x32xf32, #tpu.memory_space<vmem>>) attributes {dimension_semantics = [#tpu.dimension_semantics<parallel>, #tpu.dimension_semantics<arbitrary>], iteration_bounds = array<i64: 1, 1>, scalar_prefetch = 0 : i64, scratch_operands = 1 : i64, tpu.core_type = #tpu.core_type<tc>, window_params = [{transform_indices = @transform_0, window_bounds = array<i64: 8, 8, 16>}, {transform_indices = @transform_1, window_bounds = array<i64: 8, 32>}, {pipeline_mode = #tpu.pipeline_mode<synchronous>, transform_indices = @transform_2, window_bounds = array<i64: 16, 32>}, {pipeline_mode = #tpu.pipeline_mode<synchronous>, transform_indices = @transform_3, window_bounds = array<i64: 32, 32>}, {pipeline_mode = #tpu.pipeline_mode<synchronous>, transform_indices = @transform_4, window_bounds = array<i64: 1, 32>}, {transform_indices = @transform_5, window_bounds = array<i64: 8, 8, 32>}]} {
    %c0_i32 = arith.constant 0 : i32
    %0 = arith.cmpi eq, %arg1, %c0_i32 : i32
    %1 = arith.extui %0 : i1 to i32
    %c0_i32_0 = arith.constant 0 : i32
    %2 = arith.cmpi ne, %1, %c0_i32_0 : i32
    scf.if %2 {
      %c0_128 = arith.constant 0 : index
      %c0_129 = arith.constant 0 : index
      %147 = vector.load %arg3[%c0_128, %c0_129] : memref<8x32xf32, #tpu.memory_space<vmem>>, vector<8x32xf32>
      %c0_130 = arith.constant 0 : index
      %c0_131 = arith.constant 0 : index
      %148 = vector.load %arg8[%c0_130, %c0_131] : memref<8x32xf32, #tpu.memory_space<vmem>>, vector<8x32xf32>
      tpu.vector_store %arg8[%c0_130, %c0_131], %147 {strides = array<i32>} : memref<8x32xf32, #tpu.memory_space<vmem>>, vector<8x32xf32>,
    } else {
    }
    %c0_i32_1 = arith.constant 0 : i32
    %3 = arith.index_cast %c0_i32_1 : i32 to index
    %c0 = arith.constant 0 : index
    %c0_2 = arith.constant 0 : index
    %4 = vector.load %arg2[%3, %c0, %c0_2] : memref<8x8x16xf32, #tpu.memory_space<vmem>>, vector<1x8x16xf32>
    %5 = vector.shape_cast %4 : vector<1x8x16xf32> to vector<8x16xf32>
    %c0_3 = arith.constant 0 : index
    %c0_4 = arith.constant 0 : index
    %6 = vector.load %arg4[%c0_3, %c0_4] : memref<16x32xf32, #tpu.memory_space<vmem>>, vector<16x32xf32>
    %cst = arith.constant dense<0.000000e+00> : vector<8x32xf32>
    %7 = tpu.matmul %5, %6, %cst {dimension_numbers = #tpu.dot_dimension_numbers<[1], [0], [0], [1], [0, 0, 1, 1], [], []>} : vector<8x16xf32>, vector<16x32xf32>, vector<8x32xf32> -> vector<8x32xf32>
    %c0_5 = arith.constant 0 : index
    %c0_6 = arith.constant 0 : index
    %8 = vector.load %arg8[%c0_5, %c0_6] : memref<8x32xf32, #tpu.memory_space<vmem>>, vector<8x32xf32>
    %c0_7 = arith.constant 0 : index
    %c0_8 = arith.constant 0 : index
    %9 = vector.load %arg5[%c0_7, %c0_8] : memref<32x32xf32, #tpu.memory_space<vmem>>, vector<32x32xf32>
    %cst_9 = arith.constant dense<0.000000e+00> : vector<8x32xf32>
    %10 = tpu.matmul %8, %9, %cst_9 {dimension_numbers = #tpu.dot_dimension_numbers<[1], [0], [0], [1], [0, 0, 1, 1], [], []>} : vector<8x32xf32>, vector<32x32xf32>, vector<8x32xf32> -> vector<8x32xf32>
    %11 = arith.addf %7, %10 : vector<8x32xf32>
    %c0_10 = arith.constant 0 : index
    %c0_11 = arith.constant 0 : index
    %12 = vector.load %arg6[%c0_10, %c0_11] : memref<1x32xf32, #tpu.memory_space<vmem>>, vector<1x32xf32>
    %13 = vector.broadcast %12 : vector<1x32xf32> to vector<8x32xf32>
    %14 = arith.addf %11, %13 : vector<8x32xf32>
    %15 = math.tanh %14 : vector<8x32xf32>
    %16 = arith.index_cast %c0_i32_1 : i32 to index
    %c0_12 = arith.constant 0 : index
    %c0_13 = arith.constant 0 : index
    %17 = vector.load %arg7[%16, %c0_12, %c0_13] : memref<8x8x32xf32, #tpu.memory_space<vmem>>, vector<1x8x32xf32>
    %18 = vector.shape_cast %17 : vector<1x8x32xf32> to vector<8x32xf32>
    %19 = vector.shape_cast %15 : vector<8x32xf32> to vector<1x8x32xf32>
    tpu.vector_store %arg7[%16, %c0_12, %c0_13], %19 {strides = array<i32>} : memref<8x8x32xf32, #tpu.memory_space<vmem>>, vector<1x8x32xf32>,
    %c0_14 = arith.constant 0 : index
    %c0_15 = arith.constant 0 : index
    %20 = vector.load %arg8[%c0_14, %c0_15] : memref<8x32xf32, #tpu.memory_space<vmem>>, vector<8x32xf32>
    tpu.vector_store %arg8[%c0_14, %c0_15], %15 {strides = array<i32>} : memref<8x32xf32, #tpu.memory_space<vmem>>, vector<8x32xf32>,
    %c1_i32 = arith.constant 1 : i32
    %21 = arith.index_cast %c1_i32 : i32 to index
    %c0_16 = arith.constant 0 : index
    %c0_17 = arith.constant 0 : index
    %22 = vector.load %arg2[%21, %c0_16, %c0_17] : memref<8x8x16xf32, #tpu.memory_space<vmem>>, vector<1x8x16xf32>
    %23 = vector.shape_cast %22 : vector<1x8x16xf32> to vector<8x16xf32>
    %c0_18 = arith.constant 0 : index
    %c0_19 = arith.constant 0 : index
    %24 = vector.load %arg4[%c0_18, %c0_19] : memref<16x32xf32, #tpu.memory_space<vmem>>, vector<16x32xf32>
    %cst_20 = arith.constant dense<0.000000e+00> : vector<8x32xf32>
    %25 = tpu.matmul %23, %24, %cst_20 {dimension_numbers = #tpu.dot_dimension_numbers<[1], [0], [0], [1], [0, 0, 1, 1], [], []>} : vector<8x16xf32>, vector<16x32xf32>, vector<8x32xf32> -> vector<8x32xf32>
    %c0_21 = arith.constant 0 : index
    %c0_22 = arith.constant 0 : index
    %26 = vector.load %arg8[%c0_21, %c0_22] : memref<8x32xf32, #tpu.memory_space<vmem>>, vector<8x32xf32>
    %c0_23 = arith.constant 0 : index
    %c0_24 = arith.constant 0 : index
    %27 = vector.load %arg5[%c0_23, %c0_24] : memref<32x32xf32, #tpu.memory_space<vmem>>, vector<32x32xf32>
    %cst_25 = arith.constant dense<0.000000e+00> : vector<8x32xf32>
    %28 = tpu.matmul %26, %27, %cst_25 {dimension_numbers = #tpu.dot_dimension_numbers<[1], [0], [0], [1], [0, 0, 1, 1], [], []>} : vector<8x32xf32>, vector<32x32xf32>, vector<8x32xf32> -> vector<8x32xf32>
    %29 = arith.addf %25, %28 : vector<8x32xf32>
    %c0_26 = arith.constant 0 : index
    %c0_27 = arith.constant 0 : index
    %30 = vector.load %arg6[%c0_26, %c0_27] : memref<1x32xf32, #tpu.memory_space<vmem>>, vector<1x32xf32>
    %31 = vector.broadcast %30 : vector<1x32xf32> to vector<8x32xf32>
    %32 = arith.addf %29, %31 : vector<8x32xf32>
    %33 = math.tanh %32 : vector<8x32xf32>
    %34 = arith.index_cast %c1_i32 : i32 to index
    %c0_28 = arith.constant 0 : index
    %c0_29 = arith.constant 0 : index
    %35 = vector.load %arg7[%34, %c0_28, %c0_29] : memref<8x8x32xf32, #tpu.memory_space<vmem>>, vector<1x8x32xf32>
    %36 = vector.shape_cast %35 : vector<1x8x32xf32> to vector<8x32xf32>
    %37 = vector.shape_cast %33 : vector<8x32xf32> to vector<1x8x32xf32>
    tpu.vector_store %arg7[%34, %c0_28, %c0_29], %37 {strides = array<i32>} : memref<8x8x32xf32, #tpu.memory_space<vmem>>, vector<1x8x32xf32>,
    %c0_30 = arith.constant 0 : index
    %c0_31 = arith.constant 0 : index
    %38 = vector.load %arg8[%c0_30, %c0_31] : memref<8x32xf32, #tpu.memory_space<vmem>>, vector<8x32xf32>
    tpu.vector_store %arg8[%c0_30, %c0_31], %33 {strides = array<i32>} : memref<8x32xf32, #tpu.memory_space<vmem>>, vector<8x32xf32>,
    %c2_i32 = arith.constant 2 : i32
    %39 = arith.index_cast %c2_i32 : i32 to index
    %c0_32 = arith.constant 0 : index
    %c0_33 = arith.constant 0 : index
    %40 = vector.load %arg2[%39, %c0_32, %c0_33] : memref<8x8x16xf32, #tpu.memory_space<vmem>>, vector<1x8x16xf32>
    %41 = vector.shape_cast %40 : vector<1x8x16xf32> to vector<8x16xf32>
    %c0_34 = arith.constant 0 : index
    %c0_35 = arith.constant 0 : index
    %42 = vector.load %arg4[%c0_34, %c0_35] : memref<16x32xf32, #tpu.memory_space<vmem>>, vector<16x32xf32>
    %cst_36 = arith.constant dense<0.000000e+00> : vector<8x32xf32>
    %43 = tpu.matmul %41, %42, %cst_36 {dimension_numbers = #tpu.dot_dimension_numbers<[1], [0], [0], [1], [0, 0, 1, 1], [], []>} : vector<8x16xf32>, vector<16x32xf32>, vector<8x32xf32> -> vector<8x32xf32>
    %c0_37 = arith.constant 0 : index
    %c0_38 = arith.constant 0 : index
    %44 = vector.load %arg8[%c0_37, %c0_38] : memref<8x32xf32, #tpu.memory_space<vmem>>, vector<8x32xf32>
    %c0_39 = arith.constant 0 : index
    %c0_40 = arith.constant 0 : index
    %45 = vector.load %arg5[%c0_39, %c0_40] : memref<32x32xf32, #tpu.memory_space<vmem>>, vector<32x32xf32>
    %cst_41 = arith.constant dense<0.000000e+00> : vector<8x32xf32>
    %46 = tpu.matmul %44, %45, %cst_41 {dimension_numbers = #tpu.dot_dimension_numbers<[1], [0], [0], [1], [0, 0, 1, 1], [], []>} : vector<8x32xf32>, vector<32x32xf32>, vector<8x32xf32> -> vector<8x32xf32>
    %47 = arith.addf %43, %46 : vector<8x32xf32>
    %c0_42 = arith.constant 0 : index
    %c0_43 = arith.constant 0 : index
    %48 = vector.load %arg6[%c0_42, %c0_43] : memref<1x32xf32, #tpu.memory_space<vmem>>, vector<1x32xf32>
    %49 = vector.broadcast %48 : vector<1x32xf32> to vector<8x32xf32>
    %50 = arith.addf %47, %49 : vector<8x32xf32>
    %51 = math.tanh %50 : vector<8x32xf32>
    %52 = arith.index_cast %c2_i32 : i32 to index
    %c0_44 = arith.constant 0 : index
    %c0_45 = arith.constant 0 : index
    %53 = vector.load %arg7[%52, %c0_44, %c0_45] : memref<8x8x32xf32, #tpu.memory_space<vmem>>, vector<1x8x32xf32>
    %54 = vector.shape_cast %53 : vector<1x8x32xf32> to vector<8x32xf32>
    %55 = vector.shape_cast %51 : vector<8x32xf32> to vector<1x8x32xf32>
    tpu.vector_store %arg7[%52, %c0_44, %c0_45], %55 {strides = array<i32>} : memref<8x8x32xf32, #tpu.memory_space<vmem>>, vector<1x8x32xf32>,
    %c0_46 = arith.constant 0 : index
    %c0_47 = arith.constant 0 : index
    %56 = vector.load %arg8[%c0_46, %c0_47] : memref<8x32xf32, #tpu.memory_space<vmem>>, vector<8x32xf32>
    tpu.vector_store %arg8[%c0_46, %c0_47], %51 {strides = array<i32>} : memref<8x32xf32, #tpu.memory_space<vmem>>, vector<8x32xf32>,
    %c3_i32 = arith.constant 3 : i32
    %57 = arith.index_cast %c3_i32 : i32 to index
    %c0_48 = arith.constant 0 : index
    %c0_49 = arith.constant 0 : index
    %58 = vector.load %arg2[%57, %c0_48, %c0_49] : memref<8x8x16xf32, #tpu.memory_space<vmem>>, vector<1x8x16xf32>
    %59 = vector.shape_cast %58 : vector<1x8x16xf32> to vector<8x16xf32>
    %c0_50 = arith.constant 0 : index
    %c0_51 = arith.constant 0 : index
    %60 = vector.load %arg4[%c0_50, %c0_51] : memref<16x32xf32, #tpu.memory_space<vmem>>, vector<16x32xf32>
    %cst_52 = arith.constant dense<0.000000e+00> : vector<8x32xf32>
    %61 = tpu.matmul %59, %60, %cst_52 {dimension_numbers = #tpu.dot_dimension_numbers<[1], [0], [0], [1], [0, 0, 1, 1], [], []>} : vector<8x16xf32>, vector<16x32xf32>, vector<8x32xf32> -> vector<8x32xf32>
    %c0_53 = arith.constant 0 : index
    %c0_54 = arith.constant 0 : index
    %62 = vector.load %arg8[%c0_53, %c0_54] : memref<8x32xf32, #tpu.memory_space<vmem>>, vector<8x32xf32>
    %c0_55 = arith.constant 0 : index
    %c0_56 = arith.constant 0 : index
    %63 = vector.load %arg5[%c0_55, %c0_56] : memref<32x32xf32, #tpu.memory_space<vmem>>, vector<32x32xf32>
    %cst_57 = arith.constant dense<0.000000e+00> : vector<8x32xf32>
    %64 = tpu.matmul %62, %63, %cst_57 {dimension_numbers = #tpu.dot_dimension_numbers<[1], [0], [0], [1], [0, 0, 1, 1], [], []>} : vector<8x32xf32>, vector<32x32xf32>, vector<8x32xf32> -> vector<8x32xf32>
    %65 = arith.addf %61, %64 : vector<8x32xf32>
    %c0_58 = arith.constant 0 : index
    %c0_59 = arith.constant 0 : index
    %66 = vector.load %arg6[%c0_58, %c0_59] : memref<1x32xf32, #tpu.memory_space<vmem>>, vector<1x32xf32>
    %67 = vector.broadcast %66 : vector<1x32xf32> to vector<8x32xf32>
    %68 = arith.addf %65, %67 : vector<8x32xf32>
    %69 = math.tanh %68 : vector<8x32xf32>
    %70 = arith.index_cast %c3_i32 : i32 to index
    %c0_60 = arith.constant 0 : index
    %c0_61 = arith.constant 0 : index
    %71 = vector.load %arg7[%70, %c0_60, %c0_61] : memref<8x8x32xf32, #tpu.memory_space<vmem>>, vector<1x8x32xf32>
    %72 = vector.shape_cast %71 : vector<1x8x32xf32> to vector<8x32xf32>
    %73 = vector.shape_cast %69 : vector<8x32xf32> to vector<1x8x32xf32>
    tpu.vector_store %arg7[%70, %c0_60, %c0_61], %73 {strides = array<i32>} : memref<8x8x32xf32, #tpu.memory_space<vmem>>, vector<1x8x32xf32>,
    %c0_62 = arith.constant 0 : index
    %c0_63 = arith.constant 0 : index
    %74 = vector.load %arg8[%c0_62, %c0_63] : memref<8x32xf32, #tpu.memory_space<vmem>>, vector<8x32xf32>
    tpu.vector_store %arg8[%c0_62, %c0_63], %69 {strides = array<i32>} : memref<8x32xf32, #tpu.memory_space<vmem>>, vector<8x32xf32>,
    %c4_i32 = arith.constant 4 : i32
    %75 = arith.index_cast %c4_i32 : i32 to index
    %c0_64 = arith.constant 0 : index
    %c0_65 = arith.constant 0 : index
    %76 = vector.load %arg2[%75, %c0_64, %c0_65] : memref<8x8x16xf32, #tpu.memory_space<vmem>>, vector<1x8x16xf32>
    %77 = vector.shape_cast %76 : vector<1x8x16xf32> to vector<8x16xf32>
    %c0_66 = arith.constant 0 : index
    %c0_67 = arith.constant 0 : index
    %78 = vector.load %arg4[%c0_66, %c0_67] : memref<16x32xf32, #tpu.memory_space<vmem>>, vector<16x32xf32>
    %cst_68 = arith.constant dense<0.000000e+00> : vector<8x32xf32>
    %79 = tpu.matmul %77, %78, %cst_68 {dimension_numbers = #tpu.dot_dimension_numbers<[1], [0], [0], [1], [0, 0, 1, 1], [], []>} : vector<8x16xf32>, vector<16x32xf32>, vector<8x32xf32> -> vector<8x32xf32>
    %c0_69 = arith.constant 0 : index
    %c0_70 = arith.constant 0 : index
    %80 = vector.load %arg8[%c0_69, %c0_70] : memref<8x32xf32, #tpu.memory_space<vmem>>, vector<8x32xf32>
    %c0_71 = arith.constant 0 : index
    %c0_72 = arith.constant 0 : index
    %81 = vector.load %arg5[%c0_71, %c0_72] : memref<32x32xf32, #tpu.memory_space<vmem>>, vector<32x32xf32>
    %cst_73 = arith.constant dense<0.000000e+00> : vector<8x32xf32>
    %82 = tpu.matmul %80, %81, %cst_73 {dimension_numbers = #tpu.dot_dimension_numbers<[1], [0], [0], [1], [0, 0, 1, 1], [], []>} : vector<8x32xf32>, vector<32x32xf32>, vector<8x32xf32> -> vector<8x32xf32>
    %83 = arith.addf %79, %82 : vector<8x32xf32>
    %c0_74 = arith.constant 0 : index
    %c0_75 = arith.constant 0 : index
    %84 = vector.load %arg6[%c0_74, %c0_75] : memref<1x32xf32, #tpu.memory_space<vmem>>, vector<1x32xf32>
    %85 = vector.broadcast %84 : vector<1x32xf32> to vector<8x32xf32>
    %86 = arith.addf %83, %85 : vector<8x32xf32>
    %87 = math.tanh %86 : vector<8x32xf32>
    %88 = arith.index_cast %c4_i32 : i32 to index
    %c0_76 = arith.constant 0 : index
    %c0_77 = arith.constant 0 : index
    %89 = vector.load %arg7[%88, %c0_76, %c0_77] : memref<8x8x32xf32, #tpu.memory_space<vmem>>, vector<1x8x32xf32>
    %90 = vector.shape_cast %89 : vector<1x8x32xf32> to vector<8x32xf32>
    %91 = vector.shape_cast %87 : vector<8x32xf32> to vector<1x8x32xf32>
    tpu.vector_store %arg7[%88, %c0_76, %c0_77], %91 {strides = array<i32>} : memref<8x8x32xf32, #tpu.memory_space<vmem>>, vector<1x8x32xf32>,
    %c0_78 = arith.constant 0 : index
    %c0_79 = arith.constant 0 : index
    %92 = vector.load %arg8[%c0_78, %c0_79] : memref<8x32xf32, #tpu.memory_space<vmem>>, vector<8x32xf32>
    tpu.vector_store %arg8[%c0_78, %c0_79], %87 {strides = array<i32>} : memref<8x32xf32, #tpu.memory_space<vmem>>, vector<8x32xf32>,
    %c5_i32 = arith.constant 5 : i32
    %93 = arith.index_cast %c5_i32 : i32 to index
    %c0_80 = arith.constant 0 : index
    %c0_81 = arith.constant 0 : index
    %94 = vector.load %arg2[%93, %c0_80, %c0_81] : memref<8x8x16xf32, #tpu.memory_space<vmem>>, vector<1x8x16xf32>
    %95 = vector.shape_cast %94 : vector<1x8x16xf32> to vector<8x16xf32>
    %c0_82 = arith.constant 0 : index
    %c0_83 = arith.constant 0 : index
    %96 = vector.load %arg4[%c0_82, %c0_83] : memref<16x32xf32, #tpu.memory_space<vmem>>, vector<16x32xf32>
    %cst_84 = arith.constant dense<0.000000e+00> : vector<8x32xf32>
    %97 = tpu.matmul %95, %96, %cst_84 {dimension_numbers = #tpu.dot_dimension_numbers<[1], [0], [0], [1], [0, 0, 1, 1], [], []>} : vector<8x16xf32>, vector<16x32xf32>, vector<8x32xf32> -> vector<8x32xf32>
    %c0_85 = arith.constant 0 : index
    %c0_86 = arith.constant 0 : index
    %98 = vector.load %arg8[%c0_85, %c0_86] : memref<8x32xf32, #tpu.memory_space<vmem>>, vector<8x32xf32>
    %c0_87 = arith.constant 0 : index
    %c0_88 = arith.constant 0 : index
    %99 = vector.load %arg5[%c0_87, %c0_88] : memref<32x32xf32, #tpu.memory_space<vmem>>, vector<32x32xf32>
    %cst_89 = arith.constant dense<0.000000e+00> : vector<8x32xf32>
    %100 = tpu.matmul %98, %99, %cst_89 {dimension_numbers = #tpu.dot_dimension_numbers<[1], [0], [0], [1], [0, 0, 1, 1], [], []>} : vector<8x32xf32>, vector<32x32xf32>, vector<8x32xf32> -> vector<8x32xf32>
    %101 = arith.addf %97, %100 : vector<8x32xf32>
    %c0_90 = arith.constant 0 : index
    %c0_91 = arith.constant 0 : index
    %102 = vector.load %arg6[%c0_90, %c0_91] : memref<1x32xf32, #tpu.memory_space<vmem>>, vector<1x32xf32>
    %103 = vector.broadcast %102 : vector<1x32xf32> to vector<8x32xf32>
    %104 = arith.addf %101, %103 : vector<8x32xf32>
    %105 = math.tanh %104 : vector<8x32xf32>
    %106 = arith.index_cast %c5_i32 : i32 to index
    %c0_92 = arith.constant 0 : index
    %c0_93 = arith.constant 0 : index
    %107 = vector.load %arg7[%106, %c0_92, %c0_93] : memref<8x8x32xf32, #tpu.memory_space<vmem>>, vector<1x8x32xf32>
    %108 = vector.shape_cast %107 : vector<1x8x32xf32> to vector<8x32xf32>
    %109 = vector.shape_cast %105 : vector<8x32xf32> to vector<1x8x32xf32>
    tpu.vector_store %arg7[%106, %c0_92, %c0_93], %109 {strides = array<i32>} : memref<8x8x32xf32, #tpu.memory_space<vmem>>, vector<1x8x32xf32>,
    %c0_94 = arith.constant 0 : index
    %c0_95 = arith.constant 0 : index
    %110 = vector.load %arg8[%c0_94, %c0_95] : memref<8x32xf32, #tpu.memory_space<vmem>>, vector<8x32xf32>
    tpu.vector_store %arg8[%c0_94, %c0_95], %105 {strides = array<i32>} : memref<8x32xf32, #tpu.memory_space<vmem>>, vector<8x32xf32>,
    %c6_i32 = arith.constant 6 : i32
    %111 = arith.index_cast %c6_i32 : i32 to index
    %c0_96 = arith.constant 0 : index
    %c0_97 = arith.constant 0 : index
    %112 = vector.load %arg2[%111, %c0_96, %c0_97] : memref<8x8x16xf32, #tpu.memory_space<vmem>>, vector<1x8x16xf32>
    %113 = vector.shape_cast %112 : vector<1x8x16xf32> to vector<8x16xf32>
    %c0_98 = arith.constant 0 : index
    %c0_99 = arith.constant 0 : index
    %114 = vector.load %arg4[%c0_98, %c0_99] : memref<16x32xf32, #tpu.memory_space<vmem>>, vector<16x32xf32>
    %cst_100 = arith.constant dense<0.000000e+00> : vector<8x32xf32>
    %115 = tpu.matmul %113, %114, %cst_100 {dimension_numbers = #tpu.dot_dimension_numbers<[1], [0], [0], [1], [0, 0, 1, 1], [], []>} : vector<8x16xf32>, vector<16x32xf32>, vector<8x32xf32> -> vector<8x32xf32>
    %c0_101 = arith.constant 0 : index
    %c0_102 = arith.constant 0 : index
    %116 = vector.load %arg8[%c0_101, %c0_102] : memref<8x32xf32, #tpu.memory_space<vmem>>, vector<8x32xf32>
    %c0_103 = arith.constant 0 : index
    %c0_104 = arith.constant 0 : index
    %117 = vector.load %arg5[%c0_103, %c0_104] : memref<32x32xf32, #tpu.memory_space<vmem>>, vector<32x32xf32>
    %cst_105 = arith.constant dense<0.000000e+00> : vector<8x32xf32>
    %118 = tpu.matmul %116, %117, %cst_105 {dimension_numbers = #tpu.dot_dimension_numbers<[1], [0], [0], [1], [0, 0, 1, 1], [], []>} : vector<8x32xf32>, vector<32x32xf32>, vector<8x32xf32> -> vector<8x32xf32>
    %119 = arith.addf %115, %118 : vector<8x32xf32>
    %c0_106 = arith.constant 0 : index
    %c0_107 = arith.constant 0 : index
    %120 = vector.load %arg6[%c0_106, %c0_107] : memref<1x32xf32, #tpu.memory_space<vmem>>, vector<1x32xf32>
    %121 = vector.broadcast %120 : vector<1x32xf32> to vector<8x32xf32>
    %122 = arith.addf %119, %121 : vector<8x32xf32>
    %123 = math.tanh %122 : vector<8x32xf32>
    %124 = arith.index_cast %c6_i32 : i32 to index
    %c0_108 = arith.constant 0 : index
    %c0_109 = arith.constant 0 : index
    %125 = vector.load %arg7[%124, %c0_108, %c0_109] : memref<8x8x32xf32, #tpu.memory_space<vmem>>, vector<1x8x32xf32>
    %126 = vector.shape_cast %125 : vector<1x8x32xf32> to vector<8x32xf32>
    %127 = vector.shape_cast %123 : vector<8x32xf32> to vector<1x8x32xf32>
    tpu.vector_store %arg7[%124, %c0_108, %c0_109], %127 {strides = array<i32>} : memref<8x8x32xf32, #tpu.memory_space<vmem>>, vector<1x8x32xf32>,
    %c0_110 = arith.constant 0 : index
    %c0_111 = arith.constant 0 : index
    %128 = vector.load %arg8[%c0_110, %c0_111] : memref<8x32xf32, #tpu.memory_space<vmem>>, vector<8x32xf32>
    tpu.vector_store %arg8[%c0_110, %c0_111], %123 {strides = array<i32>} : memref<8x32xf32, #tpu.memory_space<vmem>>, vector<8x32xf32>,
    %c7_i32 = arith.constant 7 : i32
    %129 = arith.index_cast %c7_i32 : i32 to index
    %c0_112 = arith.constant 0 : index
    %c0_113 = arith.constant 0 : index
    %130 = vector.load %arg2[%129, %c0_112, %c0_113] : memref<8x8x16xf32, #tpu.memory_space<vmem>>, vector<1x8x16xf32>
    %131 = vector.shape_cast %130 : vector<1x8x16xf32> to vector<8x16xf32>
    %c0_114 = arith.constant 0 : index
    %c0_115 = arith.constant 0 : index
    %132 = vector.load %arg4[%c0_114, %c0_115] : memref<16x32xf32, #tpu.memory_space<vmem>>, vector<16x32xf32>
    %cst_116 = arith.constant dense<0.000000e+00> : vector<8x32xf32>
    %133 = tpu.matmul %131, %132, %cst_116 {dimension_numbers = #tpu.dot_dimension_numbers<[1], [0], [0], [1], [0, 0, 1, 1], [], []>} : vector<8x16xf32>, vector<16x32xf32>, vector<8x32xf32> -> vector<8x32xf32>
    %c0_117 = arith.constant 0 : index
    %c0_118 = arith.constant 0 : index
    %134 = vector.load %arg8[%c0_117, %c0_118] : memref<8x32xf32, #tpu.memory_space<vmem>>, vector<8x32xf32>
    %c0_119 = arith.constant 0 : index
    %c0_120 = arith.constant 0 : index
    %135 = vector.load %arg5[%c0_119, %c0_120] : memref<32x32xf32, #tpu.memory_space<vmem>>, vector<32x32xf32>
    %cst_121 = arith.constant dense<0.000000e+00> : vector<8x32xf32>
    %136 = tpu.matmul %134, %135, %cst_121 {dimension_numbers = #tpu.dot_dimension_numbers<[1], [0], [0], [1], [0, 0, 1, 1], [], []>} : vector<8x32xf32>, vector<32x32xf32>, vector<8x32xf32> -> vector<8x32xf32>
    %137 = arith.addf %133, %136 : vector<8x32xf32>
    %c0_122 = arith.constant 0 : index
    %c0_123 = arith.constant 0 : index
    %138 = vector.load %arg6[%c0_122, %c0_123] : memref<1x32xf32, #tpu.memory_space<vmem>>, vector<1x32xf32>
    %139 = vector.broadcast %138 : vector<1x32xf32> to vector<8x32xf32>
    %140 = arith.addf %137, %139 : vector<8x32xf32>
    %141 = math.tanh %140 : vector<8x32xf32>
    %142 = arith.index_cast %c7_i32 : i32 to index
    %c0_124 = arith.constant 0 : index
    %c0_125 = arith.constant 0 : index
    %143 = vector.load %arg7[%142, %c0_124, %c0_125] : memref<8x8x32xf32, #tpu.memory_space<vmem>>, vector<1x8x32xf32>
    %144 = vector.shape_cast %143 : vector<1x8x32xf32> to vector<8x32xf32>
    %145 = vector.shape_cast %141 : vector<8x32xf32> to vector<1x8x32xf32>
    tpu.vector_store %arg7[%142, %c0_124, %c0_125], %145 {strides = array<i32>} : memref<8x8x32xf32, #tpu.memory_space<vmem>>, vector<1x8x32xf32>,
    %c0_126 = arith.constant 0 : index
    %c0_127 = arith.constant 0 : index
    %146 = vector.load %arg8[%c0_126, %c0_127] : memref<8x32xf32, #tpu.memory_space<vmem>>, vector<8x32xf32>
    tpu.vector_store %arg8[%c0_126, %c0_127], %141 {strides = array<i32>} : memref<8x32xf32, #tpu.memory_space<vmem>>, vector<8x32xf32>,
    %c8_i32 = arith.constant 8 : i32
    return
  }
  func.func @transform_0(%arg0: i32, %arg1: i32) -> (i32, i32, i32) {
    %c0_i32 = arith.constant 0 : i32
    %c0_i32_0 = arith.constant 0 : i32
    return %arg1, %arg0, %c0_i32 : i32, i32, i32
  }
  func.func @transform_1(%arg0: i32, %arg1: i32) -> (i32, i32) {
    %c0_i32 = arith.constant 0 : i32
    %c0_i32_0 = arith.constant 0 : i32
    return %arg0, %c0_i32 : i32, i32
  }
  func.func @transform_2(%arg0: i32, %arg1: i32) -> (i32, i32) {
    %c0_i32 = arith.constant 0 : i32
    %c0_i32_0 = arith.constant 0 : i32
    %c0_i32_1 = arith.constant 0 : i32
    return %c0_i32, %c0_i32_0 : i32, i32
  }
  func.func @transform_3(%arg0: i32, %arg1: i32) -> (i32, i32) {
    %c0_i32 = arith.constant 0 : i32
    %c0_i32_0 = arith.constant 0 : i32
    %c0_i32_1 = arith.constant 0 : i32
    return %c0_i32, %c0_i32_0 : i32, i32
  }
  func.func @transform_4(%arg0: i32, %arg1: i32) -> (i32, i32) {
    %c0_i32 = arith.constant 0 : i32
    %c0_i32_0 = arith.constant 0 : i32
    %c0_i32_1 = arith.constant 0 : i32
    return %c0_i32, %c0_i32_0 : i32, i32
  }
  func.func @transform_5(%arg0: i32, %arg1: i32) -> (i32, i32, i32) {
    %c0_i32 = arith.constant 0 : i32
    %c0_i32_0 = arith.constant 0 : i32
    return %arg1, %arg0, %c0_i32 : i32, i32, i32
  }
}

</mosaic_0001>

<bundles_post_ra>
// kernel: tpu_custom_call.1
= control target key start
LH: loop header
LB: loop body
LE: loop exit
PB: predicated region body
PF: predicated region fallthrough
CT: control target
= control target key end

     0   :  { %10 = vsyncpa [#allocation4], 0  ;;  %s2142_s0 = inlined_call_operand.hbm [shape: f32[8,8,16], index: 0, kind: input, shape index: {}]   ;;  %s2143_s1 = inlined_call_operand.hbm [shape: f32[8,32], index: 1, kind: input, shape index: {}]   ;;  %s2144_s2 = inlined_call_operand.hbm [shape: f32[16,32], index: 2, kind: input, shape index: {}]   ;;  %s2145_s3 = inlined_call_operand.hbm [shape: f32[32,32], index: 3, kind: input, shape index: {}]   ;;  %s2146_s4 = inlined_call_operand.vmem [shape: f32[1,32], index: 4, kind: input, shape index: {}]   ;;  %s2147_s5 = inlined_call_operand.hbm [shape: f32[8,8,32], index: 5, kind: output, shape index: {}]  }
   0x1   :  { %11 = vsyncpa [#allocation7], 0 }
   0x2   :  { %12 = vsyncpa [#allocation10], 0 }
   0x3   :  { %13 = vsyncpa [#allocation5], 0  ;;  %s1884_s18 = smov [#allocation6]   ;;  %s1885_s20 = smov [#allocation3]  }
   0x4   :  { %s32_s19 = sshll.u32 %s1884_s18, 4  ;;  %s19_s21 = sshll.u32 %s1885_s20, 4  ;;  %s33_s19 = int_to_ptr.vmem [resolvable:$true] %s32_s19  ;;  %s1924_s21 = int_to_ptr.vmem [resolvable:$true] %s19_s21 }
   0x5   :  { %s1766_s24 = scalar_lea.hbm %s2143_s1, 128 }
   0x6   :  { %p1767_p0 = scmp.ne.s32.totalorder %s2143_s1, %s1766_s24  ;;  %p1770_p1 = scmp.lt.u32.totalorder %s1766_s24, %s2143_s1 }
   0x8   :  { %p1772_p2 = pnand %p1770_p1, %p1767_p0 }
   0xa   :  { %1775 = shalt.err (!%p1772_p2)
}
   0xb   :  { %s1776_s29 = scalar_lea.vmem %s33_s19, 128  ;;  %p1781_p4 = scmp.lt.s32.totalorder %s33_s19, %s33_s19 }
   0xc   :  { %p1777_p3 = scmp.ne.s32.totalorder %s33_s19, %s1776_s29  ;;  %p1782_p5 = scmp.lt.s32.totalorder %s1776_s29, %s1776_s29 }
   0xe   :  { %p1783_p6 = por %p1782_p5, %p1781_p4 }
  0x10   :  { %p1784_p7 = pnand %p1783_p6, %p1777_p3 }
  0x12   :  { %1787 = shalt.err (!%p1784_p7)
}
  0x13   :  { %35 = dma.hbm_to_vmem [thread:$0]  %s2143_s1, 128, %s33_s19, [#allocation7]  }
  0x14   :  { %s1788_s9 = scalar_lea.hbm %s2142_s0, 1024 }
  0x15   :  { %p1789_p8 = scmp.ne.s32.totalorder %s2142_s0, %s1788_s9  ;;  %p1792_p9 = scmp.lt.u32.totalorder %s1788_s9, %s2142_s0 }
  0x17   :  { %p1794_p10 = pnand %p1792_p9, %p1789_p8 }
  0x19   :  { %1797 = shalt.err (!%p1794_p10)
}
  0x1a   :  { %s1798_s14 = scalar_lea.vmem %s1924_s21, 1024  ;;  %p1803_p12 = scmp.lt.s32.totalorder %s1924_s21, %s1924_s21 }
  0x1b   :  { %p1799_p11 = scmp.ne.s32.totalorder %s1924_s21, %s1798_s14  ;;  %p1804_p13 = scmp.lt.s32.totalorder %s1798_s14, %s1798_s14 }
  0x1d   :  { %p1805_p0 = por %p1804_p13, %p1803_p12 }
  0x1f   :  { %p1806_p1 = pnand %p1805_p0, %p1799_p11 }
  0x21   :  { %1809 = shalt.err (!%p1806_p1)
}
  0x22   :  { %s1886_s1 = smov 128   ;;  %s1887_s15 = smov 8  }
  0x23   :  { %25 = dma.hbm_to_vmem [thread:$0]  %s2142_s0, 1024, %s1924_s21, [#allocation4], %s1886_s1, %s1886_s1, %s1887_s15  }
  0x24   :  { %s1888_s18 = smov [#allocation8]   ;;  %s1889_s20 = smov [#allocation9]  }
  0x25   :  { %s41_s19 = sshll.u32 %s1888_s18, 4  ;;  %s53_s22 = sshll.u32 %s1889_s20, 4  ;;  %s42_s19 = int_to_ptr.vmem [resolvable:$true] %s41_s19  ;;  %s1958_s22 = int_to_ptr.vmem [resolvable:$true] %s53_s22 }
  0x26   :  { %s1810_s25 = scalar_lea.hbm %s2144_s2, 256 }
  0x27   :  { %p1811_p2 = scmp.ne.s32.totalorder %s2144_s2, %s1810_s25  ;;  %p1814_p3 = scmp.lt.u32.totalorder %s1810_s25, %s2144_s2 }
  0x29   :  { %p1816_p4 = pnand %p1814_p3, %p1811_p2 }
  0x2b   :  { %1819 = shalt.err (!%p1816_p4)
}
  0x2c   :  { %s1820_s0 = scalar_lea.vmem %s42_s19, 256  ;;  %p1825_p6 = scmp.lt.s32.totalorder %s42_s19, %s42_s19 }
  0x2d   :  { %p1821_p5 = scmp.ne.s32.totalorder %s42_s19, %s1820_s0  ;;  %p1826_p7 = scmp.lt.s32.totalorder %s1820_s0, %s1820_s0 }
  0x2f   :  { %p1827_p8 = por %p1826_p7, %p1825_p6 }
  0x31   :  { %p1828_p9 = pnand %p1827_p8, %p1821_p5 }
  0x33   :  { %1831 = shalt.err (!%p1828_p9)
}
  0x34   :  { %47 = dma.hbm_to_vmem [thread:$0]  %s2144_s2, 256, %s42_s19, [#allocation7], %s1886_s1, %s1886_s1, %s1887_s15  }
  0x35   :  { %s1832_s8 = scalar_lea.hbm %s2145_s3, 512 }
  0x36   :  { %p1833_p10 = scmp.ne.s32.totalorder %s2145_s3, %s1832_s8  ;;  %p1836_p11 = scmp.lt.u32.totalorder %s1832_s8, %s2145_s3 }
  0x38   :  { %p1838_p12 = pnand %p1836_p11, %p1833_p10 }
  0x3a   :  { %1841 = shalt.err (!%p1838_p12)
}
  0x3b   :  { %s1842_s13 = scalar_lea.vmem %s1958_s22, 512  ;;  %p1847_p0 = scmp.lt.s32.totalorder %s1958_s22, %s1958_s22 }
  0x3c   :  { %p1843_p13 = scmp.ne.s32.totalorder %s1958_s22, %s1842_s13  ;;  %p1848_p1 = scmp.lt.s32.totalorder %s1842_s13, %s1842_s13 }
  0x3e   :  { %p1849_p2 = por %p1848_p1, %p1847_p0 }
  0x40   :  { %p1850_p3 = pnand %p1849_p2, %p1843_p13 }
  0x42   :  { %1853 = shalt.err (!%p1850_p3)
}
  0x43   :  { %59 = dma.hbm_to_vmem [thread:$0]  %s2145_s3, 512, %s1958_s22, [#allocation10], %s1886_s1, %s1886_s1, %s1887_s15  }
  0x44   :  { %1876 = dma.done.wait [#allocation4], 1024  }
  0x45   :  { %1877 = vsyncadd [#allocation4], 4294966272 }
  0x46   :  { %1878 = dma.done.wait [#allocation7], 384  }
  0x47   :  { %1879 = vsyncadd [#allocation7], 4294966912 }
  0x48   :  { %1880 = dma.done.wait [#allocation10], 512  }
  0x49   :  { %1881 = vsyncadd [#allocation10], 4294966784  ;;  %v1890_v0 = vmov 0.0|0.0   ;;  %vm1891_vm0 = vmmov 0   ;;  %v1892_v1 = vmov 0.0   ;;  %v85_v2 = vld [vmem:[#allocation9] sm:$0xff] }
  0x4a   :  { %1668 = vmatprep.subr.bf16.mxu0 %v1890_v0  ;;  %1674 = vmatprep.subr.bf16.mxu1 %v1890_v0  ;;  %v86_v3 = vld [vmem:[#allocation9 + $0x8] sm:$0xff]  ;;  %v82_v4 = vld [vmem:[#allocation8] sm:$0xff]  ;;  %vm79_vm1 = vcmask 261120   ;;  %v83_v6 = vld [vmem:[#allocation8 + $0x8] sm:$0xff]  ;;  %vm163_vm2 = vcmask 130048  }
  0x4b   :  { %1539 = vmatprep.mubr.msk.f32.mxu1 %vm1891_vm0, %v1892_v1  ;;  %1532 = vmatprep.mubr.msk.f32.mxu0 %vm1891_vm0, %v1892_v1  ;;  %v2001_v5 = vpack.c.bf16 %v86_v3, %v85_v2  ;;  %v87_v7 = vld [vmem:[#allocation9 + $0x10] sm:$0xff]  ;;  %v88_v8 = vld [vmem:[#allocation9 + $0x18] sm:$0xff]  ;;  %v2003_v9 = vpack.c.bf16 %v83_v6, %v82_v4  ;;  %v78_v10 = vld [vmem:[#allocation6] sm:$0xff] }
  0x4c   :  { %v2006_v11 = vpack.c.bf16 %v88_v8, %v87_v7  ;;  %80 = vst.msk [vmem:[#allocation2] sm:$0xff] %vm79_vm1, %v78_v10  ;;  %v81_v12 = vld [vmem:[#allocation3] sm:$0xff]  ;;  %v249_v14 = vld [vmem:[#allocation3 + $0x8] sm:$0xff]  ;;  %v2036_v18 = vld [vmem:[%s2146_s4] ss:$0 sm:$0xff]  ;;  %s1893_s4 = smov [#allocation11]  }
  0x4d   :  { %1670 = vmatpush3.bf16.msra.mxu0 %v2001_v5  ;;  %1676 = vmatpush3.bf16.msra.mxu1 %v2003_v9  ;;  %v416_v26 = vld [vmem:[#allocation3 + $0x10] sm:$0xff]  ;;  %v583_v35 = vld [vmem:[#allocation3 + $0x18] sm:$0xff]  ;;  %v750_v44 = vld [vmem:[#allocation3 + $0x20] sm:$0xff]  ;;  %s1422_s17 = sshll.u32 %s1893_s4, 4  ;;  %s1423_s17 = int_to_ptr.vmem [resolvable:$true] %s1422_s17 }
  0x4e   :  { %1671 = vmatprep.subr.bf16.mxu0 %v1890_v0  ;;  %1677 = vmatprep.subr.bf16.mxu1 %v1890_v0  ;;  %v917_v53 = vld [vmem:[#allocation3 + $0x28] sm:$0xff]  ;;  %v1084_v62 = vld [vmem:[#allocation3 + $0x30] sm:$0xff]  ;;  %v1251_v8 = vld [vmem:[#allocation3 + $0x38] sm:$0xff]  ;;  %s1854_s18 = scalar_lea.vmem %s1423_s17, 1024  ;;  %p1859_p5 = scmp.lt.s32.totalorder %s1423_s17, %s1423_s17 }
  0x4f   :  { %p1855_p4 = scmp.ne.s32.totalorder %s1423_s17, %s1854_s18  ;;  %p1860_p6 = scmp.lt.s32.totalorder %s1854_s18, %s1854_s18 }
  0x50   :  { %1540 = vmatmul.mubr.msk.f32.vlgmr.msra.gmra.mrb[0].mxu1 %vm163_vm2, %v81_v12 }
  0x51   :  { %1673 = vmatpush3.bf16.msra.mxu0 %v2006_v11  ;;  %1679 = vmatpush3.bf16.msra.mxu1 %v2001_v5  ;;  %p1861_p7 = por %p1860_p6, %p1859_p5 }
  0x52   :  { %1683 = vmatprep.subr.bf16.mxu0 %v1890_v0  ;;  %1680 = vmatprep.subr.bf16.mxu1 %v1890_v0 }
  0x53   :  { %1550 = vmatprep.mubr.msk.f32.mxu1 %vm1891_vm0, %v1892_v1  ;;  %v84_v13 = vld [vmem:[#allocation2] sm:$0xff]  ;;  %p1862_p8 = pnand %p1861_p7, %p1855_p4 }
  0x54   :  { %1533 = vmatmul.mubr.msk.f32.vlgmr.msra.gmra.mrb[0].mxu0 %vm79_vm1, %v84_v13 }
  0x55   :  { %1685 = vmatpush3.bf16.msra.mxu0 %v2003_v9  ;;  %1682 = vmatpush3.bf16.msra.mxu1 %v2006_v11 }
  0x56   :  { %1557 = vmatprep.mubr.msk.f32.mxu0 %vm1891_vm0, %v1892_v1  ;;  %1686 = vmatprep.subr.bf16.mxu0 %v1890_v0 }
  0x57   :  { %1692 = vmatprep.subr.bf16.mxu1 %v1890_v0 }
  0x58   :  { %1558 = vmatmul.mubr.msk.f32.vlgmr.msra.gmra.mrb[2].mxu0 %vm163_vm2, %v249_v14 }
  0x59   :  { %1688 = vmatpush3.bf16.msra.mxu0 %v2001_v5  ;;  %1568 = vmatprep.mubr.msk.f32.mxu0 %vm1891_vm0, %v1892_v1 }
  0x5a   :  { %1689 = vmatprep.subr.bf16.mxu0 %v1890_v0 }
  0x5d   :  { %1691 = vmatpush3.bf16.msra.mxu0 %v2006_v11 }
  0x5e   :  { %1701 = vmatprep.subr.bf16.mxu0 %v1890_v0 }
 0x123   :  { %v233_v15 = vpop.f32.mrb[0].mxu1 }
 0x124   :  { %v1541_v16 = vpop.f32.mrb[1].mxu1 }
 0x127   :  { %v159_v17 = vpop.f32.mrb[0].mxu0 }
 0x128   :  { %v234_v19 = vadd.f32 %v233_v15, %v159_v17  ;;  %v1534_v20 = vpop.f32.mrb[1].mxu0 }
 0x12a   :  { %v244_v21 = vadd.f32 %v2036_v18, %v234_v19 }
 0x12b   :  { %v399_v24 = vpop.f32.mrb[2].mxu0 }
 0x12c   :  { %1750 = vtanh.f32 %v244_v21  ;;  %v1559_v25 = vpop.f32.mrb[3].mxu0 }
 0x136   :  { %v1751_v22 = vpop.eup %1750 }
 0x137   :  { %246 = vst.msk [vmem:[#allocation11] sm:$0xff] %vm79_vm1, %v1751_v22  ;;  %247 = vst.msk [vmem:[#allocation2] sm:$0xff] %vm79_vm1, %v1751_v22 }
 0x13e   :  { %v252_v23 = vld [vmem:[#allocation2] sm:$0xff] }
 0x13f   :  { %1551 = vmatmul.mubr.msk.f32.vlgmr.msra.gmra.mrb[2].mxu1 %vm79_vm1, %v252_v23 }
 0x140   :  { %1694 = vmatpush3.bf16.msra.mxu1 %v2003_v9  ;;  %1575 = vmatprep.mubr.msk.f32.mxu1 %vm1891_vm0, %v1892_v1 }
 0x141   :  { %1695 = vmatprep.subr.bf16.mxu1 %v1890_v0 }
 0x143   :  { %1576 = vmatmul.mubr.msk.f32.vlgmr.msra.gmra.mrb[4].mxu1 %vm163_vm2, %v416_v26 }
 0x144   :  { %1697 = vmatpush3.bf16.msra.mxu1 %v2001_v5  ;;  %1586 = vmatprep.mubr.msk.f32.mxu1 %vm1891_vm0, %v1892_v1 }
 0x145   :  { %1698 = vmatprep.subr.bf16.mxu1 %v1890_v0 }
 0x148   :  { %1700 = vmatpush3.bf16.msra.mxu1 %v2006_v11 }
 0x149   :  { %1710 = vmatprep.subr.bf16.mxu1 %v1890_v0 }
 0x212   :  { %v326_v27 = vpop.f32.mrb[2].mxu1 }
 0x213   :  { %v400_v28 = vadd.f32 %v399_v24, %v326_v27  ;;  %v1552_v29 = vpop.f32.mrb[3].mxu1 }
 0x215   :  { %v410_v30 = vadd.f32 %v2036_v18, %v400_v28 }
 0x216   :  { %v566_v33 = vpop.f32.mrb[4].mxu1 }
 0x217   :  { %1752 = vtanh.f32 %v410_v30  ;;  %v1577_v34 = vpop.f32.mrb[5].mxu1 }
 0x221   :  { %v1753_v31 = vpop.eup %1752 }
 0x222   :  { %413 = vst.msk [vmem:[#allocation11 + $0x8] sm:$0xff] %vm79_vm1, %v1753_v31  ;;  %414 = vst.msk [vmem:[#allocation2] sm:$0xff] %vm79_vm1, %v1753_v31 }
 0x229   :  { %v419_v32 = vld [vmem:[#allocation2] sm:$0xff] }
 0x22a   :  { %1569 = vmatmul.mubr.msk.f32.vlgmr.msra.gmra.mrb[4].mxu0 %vm79_vm1, %v419_v32 }
 0x22b   :  { %1703 = vmatpush3.bf16.msra.mxu0 %v2003_v9  ;;  %1593 = vmatprep.mubr.msk.f32.mxu0 %vm1891_vm0, %v1892_v1 }
 0x22c   :  { %1704 = vmatprep.subr.bf16.mxu0 %v1890_v0 }
 0x22e   :  { %1594 = vmatmul.mubr.msk.f32.vlgmr.msra.gmra.mrb[6].mxu0 %vm163_vm2, %v583_v35 }
 0x22f   :  { %1706 = vmatpush3.bf16.msra.mxu0 %v2001_v5  ;;  %1604 = vmatprep.mubr.msk.f32.mxu0 %vm1891_vm0, %v1892_v1 }
 0x230   :  { %1707 = vmatprep.subr.bf16.mxu0 %v1890_v0 }
 0x233   :  { %1709 = vmatpush3.bf16.msra.mxu0 %v2006_v11 }
 0x234   :  { %1719 = vmatprep.subr.bf16.mxu0 %v1890_v0 }
 0x2fd   :  { %v493_v36 = vpop.f32.mrb[4].mxu0 }
 0x2fe   :  { %v567_v37 = vadd.f32 %v566_v33, %v493_v36  ;;  %v1570_v38 = vpop.f32.mrb[5].mxu0 }
 0x300   :  { %v577_v39 = vadd.f32 %v2036_v18, %v567_v37 }
 0x301   :  { %v733_v42 = vpop.f32.mrb[6].mxu0 }
 0x302   :  { %1754 = vtanh.f32 %v577_v39  ;;  %v1595_v43 = vpop.f32.mrb[7].mxu0 }
 0x30c   :  { %v1755_v40 = vpop.eup %1754 }
 0x30d   :  { %580 = vst.msk [vmem:[#allocation11 + $0x10] sm:$0xff] %vm79_vm1, %v1755_v40  ;;  %581 = vst.msk [vmem:[#allocation2] sm:$0xff] %vm79_vm1, %v1755_v40 }
 0x314   :  { %v586_v41 = vld [vmem:[#allocation2] sm:$0xff] }
 0x315   :  { %1587 = vmatmul.mubr.msk.f32.vlgmr.msra.gmra.mrb[6].mxu1 %vm79_vm1, %v586_v41 }
 0x316   :  { %1712 = vmatpush3.bf16.msra.mxu1 %v2003_v9  ;;  %1611 = vmatprep.mubr.msk.f32.mxu1 %vm1891_vm0, %v1892_v1 }
 0x317   :  { %1713 = vmatprep.subr.bf16.mxu1 %v1890_v0 }
 0x319   :  { %1612 = vmatmul.mubr.msk.f32.vlgmr.msra.gmra.mrb[8].mxu1 %vm163_vm2, %v750_v44 }
 0x31a   :  { %1715 = vmatpush3.bf16.msra.mxu1 %v2001_v5  ;;  %1622 = vmatprep.mubr.msk.f32.mxu1 %vm1891_vm0, %v1892_v1 }
 0x31b   :  { %1716 = vmatprep.subr.bf16.mxu1 %v1890_v0 }
 0x31e   :  { %1718 = vmatpush3.bf16.msra.mxu1 %v2006_v11 }
 0x31f   :  { %1728 = vmatprep.subr.bf16.mxu1 %v1890_v0 }
 0x3e8   :  { %v660_v45 = vpop.f32.mrb[6].mxu1 }
 0x3e9   :  { %v734_v46 = vadd.f32 %v733_v42, %v660_v45  ;;  %v1588_v47 = vpop.f32.mrb[7].mxu1 }
 0x3eb   :  { %v744_v48 = vadd.f32 %v2036_v18, %v734_v46 }
 0x3ec   :  { %v900_v51 = vpop.f32.mrb[8].mxu1 }
 0x3ed   :  { %1756 = vtanh.f32 %v744_v48  ;;  %v1613_v52 = vpop.f32.mrb[9].mxu1 }
 0x3f7   :  { %v1757_v49 = vpop.eup %1756 }
 0x3f8   :  { %747 = vst.msk [vmem:[#allocation11 + $0x18] sm:$0xff] %vm79_vm1, %v1757_v49  ;;  %748 = vst.msk [vmem:[#allocation2] sm:$0xff] %vm79_vm1, %v1757_v49 }
 0x3ff   :  { %v753_v50 = vld [vmem:[#allocation2] sm:$0xff] }
 0x400   :  { %1605 = vmatmul.mubr.msk.f32.vlgmr.msra.gmra.mrb[8].mxu0 %vm79_vm1, %v753_v50 }
 0x401   :  { %1721 = vmatpush3.bf16.msra.mxu0 %v2003_v9  ;;  %1629 = vmatprep.mubr.msk.f32.mxu0 %vm1891_vm0, %v1892_v1 }
 0x402   :  { %1722 = vmatprep.subr.bf16.mxu0 %v1890_v0 }
 0x404   :  { %1630 = vmatmul.mubr.msk.f32.vlgmr.msra.gmra.mrb[10].mxu0 %vm163_vm2, %v917_v53 }
 0x405   :  { %1724 = vmatpush3.bf16.msra.mxu0 %v2001_v5  ;;  %1640 = vmatprep.mubr.msk.f32.mxu0 %vm1891_vm0, %v1892_v1 }
 0x406   :  { %1725 = vmatprep.subr.bf16.mxu0 %v1890_v0 }
 0x409   :  { %1727 = vmatpush3.bf16.msra.mxu0 %v2006_v11 }
 0x40a   :  { %1737 = vmatprep.subr.bf16.mxu0 %v1890_v0 }
 0x4d3   :  { %v827_v54 = vpop.f32.mrb[8].mxu0 }
 0x4d4   :  { %v901_v55 = vadd.f32 %v900_v51, %v827_v54  ;;  %v1606_v56 = vpop.f32.mrb[9].mxu0 }
 0x4d6   :  { %v911_v57 = vadd.f32 %v2036_v18, %v901_v55 }
 0x4d7   :  { %v1067_v60 = vpop.f32.mrb[10].mxu0 }
 0x4d8   :  { %1758 = vtanh.f32 %v911_v57  ;;  %v1631_v61 = vpop.f32.mrb[11].mxu0 }
 0x4e2   :  { %v1759_v58 = vpop.eup %1758 }
 0x4e3   :  { %914 = vst.msk [vmem:[#allocation11 + $0x20] sm:$0xff] %vm79_vm1, %v1759_v58  ;;  %915 = vst.msk [vmem:[#allocation2] sm:$0xff] %vm79_vm1, %v1759_v58 }
 0x4ea   :  { %v920_v59 = vld [vmem:[#allocation2] sm:$0xff] }
 0x4eb   :  { %1623 = vmatmul.mubr.msk.f32.vlgmr.msra.gmra.mrb[10].mxu1 %vm79_vm1, %v920_v59 }
 0x4ec   :  { %1730 = vmatpush3.bf16.msra.mxu1 %v2003_v9  ;;  %1647 = vmatprep.mubr.msk.f32.mxu1 %vm1891_vm0, %v1892_v1 }
 0x4ed   :  { %1731 = vmatprep.subr.bf16.mxu1 %v1890_v0 }
 0x4ef   :  { %1648 = vmatmul.mubr.msk.f32.vlgmr.msra.gmra.mrb[12].mxu1 %vm163_vm2, %v1084_v62 }
 0x4f0   :  { %1733 = vmatpush3.bf16.msra.mxu1 %v2001_v5  ;;  %1658 = vmatprep.mubr.msk.f32.mxu1 %vm1891_vm0, %v1892_v1 }
 0x4f1   :  { %1734 = vmatprep.subr.bf16.mxu1 %v1890_v0 }
 0x4f4   :  { %1736 = vmatpush3.bf16.msra.mxu1 %v2006_v11 }
 0x5be   :  { %v994_v63 = vpop.f32.mrb[10].mxu1 }
 0x5bf   :  { %v1068_v2 = vadd.f32 %v1067_v60, %v994_v63  ;;  %v1624_v3 = vpop.f32.mrb[11].mxu1 }
 0x5c1   :  { %v1078_v4 = vadd.f32 %v2036_v18, %v1068_v2 }
 0x5c2   :  { %v1234_v0 = vpop.f32.mrb[12].mxu1 }
 0x5c3   :  { %1760 = vtanh.f32 %v1078_v4  ;;  %v1649_v5 = vpop.f32.mrb[13].mxu1 }
 0x5cd   :  { %v1761_v6 = vpop.eup %1760 }
 0x5ce   :  { %1081 = vst.msk [vmem:[#allocation11 + $0x28] sm:$0xff] %vm79_vm1, %v1761_v6  ;;  %1082 = vst.msk [vmem:[#allocation2] sm:$0xff] %vm79_vm1, %v1761_v6 }
 0x5d5   :  { %v1087_v7 = vld [vmem:[#allocation2] sm:$0xff] }
 0x5d6   :  { %1641 = vmatmul.mubr.msk.f32.vlgmr.msra.gmra.mrb[12].mxu0 %vm79_vm1, %v1087_v7 }
 0x5d7   :  { %1739 = vmatpush3.bf16.msra.mxu0 %v2003_v9  ;;  %1665 = vmatprep.mubr.msk.f32.mxu0 %vm1891_vm0, %v1892_v1 }
 0x5da   :  { %1666 = vmatmul.mubr.msk.f32.vlgmr.msra.gmra.mrb[14].mxu0 %vm163_vm2, %v1251_v8 }
 0x6a9   :  { %v1161_v10 = vpop.f32.mrb[12].mxu0 }
 0x6aa   :  { %v1235_v11 = vadd.f32 %v1234_v0, %v1161_v10  ;;  %v1642_v12 = vpop.f32.mrb[13].mxu0 }
 0x6ac   :  { %v1245_v13 = vadd.f32 %v2036_v18, %v1235_v11 }
 0x6ad   :  { %v1401_v1 = vpop.f32.mrb[14].mxu0 }
 0x6ae   :  { %1762 = vtanh.f32 %v1245_v13  ;;  %v1667_v15 = vpop.f32.mrb[15].mxu0 }
 0x6b8   :  { %v1763_v14 = vpop.eup %1762 }
 0x6b9   :  { %1248 = vst.msk [vmem:[#allocation11 + $0x30] sm:$0xff] %vm79_vm1, %v1763_v14  ;;  %1249 = vst.msk [vmem:[#allocation2] sm:$0xff] %vm79_vm1, %v1763_v14 }
 0x6c0   :  { %v1254_v9 = vld [vmem:[#allocation2] sm:$0xff] }
 0x6c1   :  { %1659 = vmatmul.mubr.msk.f32.vlgmr.msra.gmra.mrb[14].mxu1 %vm79_vm1, %v1254_v9 }
 0x794   :  { %v1328_v16 = vpop.f32.mrb[14].mxu1 }
 0x795   :  { %v1402_v17 = vadd.f32 %v1401_v1, %v1328_v16  ;;  %v1660_v19 = vpop.f32.mrb[15].mxu1 }
 0x797   :  { %v1412_v20 = vadd.f32 %v2036_v18, %v1402_v17 }
 0x799   :  { %1764 = vtanh.f32 %v1412_v20 }
 0x7a3   :  { %v1765_v21 = vpop.eup %1764 }
 0x7a4   :  { %1416 = vst.msk [vmem:[#allocation2] sm:$0xff] %vm79_vm1, %v1765_v21  ;;  %1415 = vst.msk [vmem:[#allocation11 + $0x38] sm:$0xff] %vm79_vm1, %v1765_v21 }
 0x7a5   :  { %1865 = shalt.err (!%p1862_p8)
}
 0x7a6   :  { %s1866_s22 = scalar_lea.hbm %s2147_s5, 1024 }
 0x7a7   :  { %p1867_p9 = scmp.ne.s32.totalorder %s2147_s5, %s1866_s22  ;;  %p1870_p10 = scmp.lt.u32.totalorder %s1866_s22, %s2147_s5 }
 0x7a9   :  { %p1872_p11 = pnand %p1870_p10, %p1867_p9 }
 0x7ab   :  { %1875 = shalt.err (!%p1872_p11)
}
 0x7ac   :  { %1428 = dma.vmem_to_hbm [thread:$0]  %s1423_s17, 1024, %s2147_s5, [#allocation5], %s1886_s1, %s1886_s1, %s1887_s15  }
 0x7ad   :  { %1882 = dma.done.wait [#allocation5], 1024  }
 0x7ae   :  { %1883 = vsyncadd [#allocation5], 4294966272 }
 0x7af   :  { %1432 = vsyncpa [#allocation4], 1 }
 0x7b0   :  { %1433 = vsyncpa [#allocation7], 1 }
 0x7b1   :  { %1434 = vsyncpa [#allocation10], 1 }
 0x7b2   :  { %1435 = vsyncpa [#allocation5], 1 }

</bundles_post_ra>
